<compile_context>
chip_gen: v5e
topology: v5e:2x2
jax: 0.10.0
libtpu: 0.0.40
codegen_flags: <defaults>
</compile_context>

<pallas_src>
import functools

import jax
import jax.numpy as jnp
from jax import lax
from jax.experimental import pallas as pl
from jax.experimental.pallas import tpu as pltpu


_INV_SQRT2 = 0.7071067811865476


def _round_up(n, m):
    return ((n + m - 1) // m) * m


def _erf(z):
    # Abramowitz & Stegun 7.1.26 polynomial erf (max abs error 1.5e-7).
    # Built only from exp / mul / add / abs / where, all of which have
    # guaranteed Pallas-Mosaic lowerings; numerically matches the exact erf
    # used by nn.GELU() to ~1e-7.
    a = jnp.abs(z)
    t = 1.0 / (1.0 + 0.3275911 * a)
    poly = t * (0.254829592
                + t * (-0.284496736
                       + t * (1.421413741
                              + t * (-1.453152027 + t * 1.061405429))))
    e = 1.0 - poly * jnp.exp(-a * a)
    return jnp.where(z < 0, -e, e)


def mlp1_kernel(x_ref, w1_ref, b_ref, w2_ref, o_ref, *, approx_gelu):
    # x tile: (tm, D).  Elementwise math in f32 (v5e has no bf16 VPU/EUP).
    x = x_ref[...].astype(jnp.float32)

    # LayerNorm statistics, single pass (eps = nn.LayerNorm default 1e-5).
    mean = jnp.mean(x, axis=-1, keepdims=True)
    mean_sq = jnp.mean(x * x, axis=-1, keepdims=True)
    var = jnp.maximum(mean_sq - mean * mean, 0.0)   # clamp: no rsqrt(negative)
    xn = (x - mean) * lax.rsqrt(var + 1e-5)
    # The (gamma, beta) affine is folded into w1/b1 by the wrapper.

    # linear1 on the MXU: cast activations to the weight dtype (bf16 fast
    # path), accumulate in f32.
    h = jnp.dot(xn.astype(w1_ref.dtype), w1_ref[...],
                preferred_element_type=jnp.float32)
    h = h + b_ref[0:1, :]

    if approx_gelu:
        # tanh approximation -> transcendental runs on the EUP slot (the VALU
        # is the binding slot on v6e/v7x at moderate D).  Not bit-identical to
        # nn.GELU()'s default exact erf.
        h = jax.nn.gelu(h, approximate=True)
    else:
        # exact GELU, matching nn.GELU() default.
        h = 0.5 * h * (1.0 + _erf(h * _INV_SQRT2))

    # dropout(p=0) -> identity.

    # linear2 on the MXU.
    y = jnp.dot(h.astype(w2_ref.dtype), w2_ref[...],
                preferred_element_type=jnp.float32)
    y = y + b_ref[1:2, :]

    # Residual with the ORIGINAL (pre-LayerNorm) input; re-read x_ref so the
    # f32 copy is not kept live across both matmuls.
    o_ref[...] = (y + x_ref[...].astype(jnp.float32)).astype(o_ref.dtype)


def _choose_row_tile(n_rows, tm_max):
    """Row tile: >= 16 rows (bf16 sublane packing), 128-aligned once large,
    and sized so the row grid keeps >= 4 steps (pipelining within a core and
    both v7x TensorCores fed) before growing toward tm_max."""
    if n_rows <= 256:
        return min(_round_up(n_rows, 16), _round_up(tm_max, 16))
    t = (n_rows // 4 // 128) * 128
    t = max(128, min(t, tm_max))
    if t >= 256:
        t = (t // 256) * 256        # MXU-height aligned on v6e/v7x
    return t


def mlp1_forward(x, gamma, beta, w1, b1, w2, b2, *, tm=512, use_bf16=True,
                 approx_gelu=False):
    """MLP1 forward.  x: (..., D) feature-last; weights are (in, out), i.e.
    the transpose of PyTorch's nn.Linear.weight layout."""
    orig_shape = x.shape
    D = orig_shape[-1]
    x2 = x.reshape(-1, D)
    N = x2.shape[0]

    H = w1.shape[1]
    assert w1.shape == (D, H), "W1 must be (dim_hidden, expand*dim_hidden)"
    # The PyTorch module only composes when expand == 1 (linear2 expects
    # dim_hidden inputs), so H == D and both weights are (D, D).
    assert w2.shape == (H, D) and H == D, "MLP1 requires expand == 1"

    tm_eff = _choose_row_tile(N, tm)
    grid = (pl.cdiv(N, tm_eff),)

    # Weight prep: fold the LayerNorm affine into linear1, cast to the matmul
    # dtype (bf16 production path), stack the two biases into one operand.
    mm_dtype = jnp.bfloat16 if use_bf16 else jnp.float32
    g32 = gamma.astype(jnp.float32)
    be32 = beta.astype(jnp.float32)
    w1_32 = w1.astype(jnp.float32)
    w1_eff = (g32[:, None] * w1_32).astype(mm_dtype)              # (D, H)
    w2_eff = w2.astype(mm_dtype)                                  # (H, D)
    b1_eff = b1.astype(jnp.float32) + be32 @ w1_32                # (H,)
    biases = jnp.stack([b1_eff, b2.astype(jnp.float32)], axis=0)  # (2, D)

    # VMEM budget: x/out tiles double-buffered + weights + f32 temps, 2x
    # slack, capped at 56 MiB (v7x: 64 MiB physical per TensorCore — leave
    # room for Mosaic internal scratch and semaphores).
    w_bytes = 2 if use_bf16 else 4
    need = (4 * tm_eff * D * x2.dtype.itemsize    # x + out, double-buffered
            + 2 * 2 * D * H * w_bytes             # weights (worst case 2-buf)
            + 4 * tm_eff * max(D, H) * 4          # f32 temporaries
            + 4 * 2 * H * 4)                      # biases
    vmem_limit = int(min(56 * 1024 * 1024, max(2 * need, 32 * 1024 * 1024)))

    kernel = functools.partial(mlp1_kernel, approx_gelu=approx_gelu)

    def build(single_buffer_consts):
        # Grid-invariant operands (constant index_map): single-buffer them so
        # they don't burn 2x VMEM for zero overlap benefit.
        const_kw = ({"pipeline_mode": pl.Buffered(1)}
                    if single_buffer_consts else {})
        return pl.pallas_call(
            kernel,
            out_shape=jax.ShapeDtypeStruct((N, D), x.dtype),
            grid_spec=pltpu.PrefetchScalarGridSpec(
                num_scalar_prefetch=0,
                grid=grid,
                in_specs=[
                    pl.BlockSpec((tm_eff, D), lambda i: (i, 0)),          # x
                    pl.BlockSpec((D, H), lambda i: (0, 0), **const_kw),   # W1'
                    pl.BlockSpec((2, H), lambda i: (0, 0), **const_kw),   # b1'/b2
                    pl.BlockSpec((H, D), lambda i: (0, 0), **const_kw),   # W2
                ],
                out_specs=pl.BlockSpec((tm_eff, D), lambda i: (i, 0)),
            ),
            compiler_params=pltpu.CompilerParams(
                dimension_semantics=("parallel",),
                vmem_limit_bytes=vmem_limit,
            ),
        )

    try:
        out = build(True)(x2, w1_eff, biases, w2_eff)
    except Exception:
        # Fallback for JAX versions without BlockSpec.pipeline_mode /
        # pl.Buffered(1): identical kernel, default double buffering.
        out = build(False)(x2, w1_eff, biases, w2_eff)

    return out.reshape(orig_shape)


def mlp1_reference(x, gamma, beta, w1, b1, w2, b2):
    """Pure-JAX reference of the PyTorch forward (exact erf GELU)."""
    xf = x.astype(jnp.float32)
    mean = jnp.mean(xf, axis=-1, keepdims=True)
    var = jnp.mean((xf - mean) ** 2, axis=-1, keepdims=True)
    xn = (xf - mean) / jnp.sqrt(var + 1e-5) * gamma + beta
    h = xn @ w1 + b1
    h = 0.5 * h * (1.0 + lax.erf(h * _INV_SQRT2))
    y = h @ w2 + b2
    return (y + xf).astype(x.dtype)


def _make_params(key, D):
    k1, k2, k3, k4, k5, k6 = jax.random.split(key, 6)
    # Non-trivial gamma/beta so the LayerNorm-affine fold is actually tested.
    gamma = 1.0 + 0.1 * jax.random.normal(k5, (D,), jnp.float32)
    beta = 0.1 * jax.random.normal(k6, (D,), jnp.float32)
    w1 = jax.random.normal(k1, (D, D), jnp.float32) / jnp.sqrt(D)
    b1 = 0.01 * jax.random.normal(k2, (D,), jnp.float32)
    w2 = jax.random.normal(k3, (D, D), jnp.float32) / jnp.sqrt(D)
    b2 = 0.01 * jax.random.normal(k4, (D,), jnp.float32)
    return gamma, beta, w1, b1, w2, b2


if __name__ == "__main__":
    root = jax.random.PRNGKey(0)
    kx1, kp1, kx2, kp2 = jax.random.split(root, 4)

    # --- test 1: module-consistent small shape (batch=2, seq=8, hidden=32) ---
    B, T, D = 2, 8, 32
    x = jax.random.normal(kx1, (B, T, D), dtype=jnp.float32)
    params = _make_params(kp1, D)
    ref = mlp1_reference(x, *params)

    # f32 matmul debug path + exact GELU: tight check against the reference.
    out_f32 = jax.block_until_ready(
        mlp1_forward(x, *params, use_bf16=False, approx_gelu=False))
    assert out_f32.shape == x.shape
    assert jnp.allclose(out_f32, ref, atol=1e-4, rtol=1e-4), (
        "f32 path mismatch, max|diff|=%g" % float(jnp.max(jnp.abs(out_f32 - ref))))

    # bf16 MXU production path (f32 accumulation), exact GELU: loose tolerance.
    out_bf16 = jax.block_until_ready(mlp1_forward(x, *params))
    assert jnp.allclose(out_bf16, ref, atol=2e-1, rtol=2e-2), (
        "bf16 path mismatch, max|diff|=%g" % float(jnp.max(jnp.abs(out_bf16 - ref))))

    # --- test 2: lane-dense D=128, N=400 rows -> 4 grid steps with a masked
    #             partial last block (no wrapper pad/slice), bf16 MXU + tanh
    #             (EUP) GELU fast path. ---
    B2, T2, D2 = 4, 100, 128
    x2 = jax.random.normal(kx2, (B2, T2, D2), dtype=jnp.float32)
    params2 = _make_params(kp2, D2)
    out2 = jax.block_until_ready(
        mlp1_forward(x2, *params2, use_bf16=True, approx_gelu=True))
    ref2 = mlp1_reference(x2, *params2)
    assert out2.shape == x2.shape
    assert jnp.allclose(out2, ref2, atol=2e-1, rtol=2e-2), (
        "bf16+tanh path mismatch, max|diff|=%g" % float(jnp.max(jnp.abs(out2 - ref2))))

    print("KERNEL_OK")
</pallas_src>

<mosaic_0001>
module attributes {stable_mosaic.version = 11 : i64} {
  func.func @mlp1_kernel(%arg0: i32, %arg1: memref<16x32xf32, #tpu.memory_space<vmem>>, %arg2: memref<32x32xf32, #tpu.memory_space<vmem>>, %arg3: memref<2x32xf32, #tpu.memory_space<vmem>>, %arg4: memref<32x32xf32, #tpu.memory_space<vmem>>, %arg5: memref<16x32xf32, #tpu.memory_space<vmem>>) attributes {dimension_semantics = [#tpu.dimension_semantics<parallel>], iteration_bounds = array<i64: 1>, scalar_prefetch = 0 : i64, scratch_operands = 0 : i64, tpu.core_type = #tpu.core_type<tc>, window_params = [{transform_indices = @transform_0, window_bounds = array<i64: 16, 32>}, {pipeline_mode = #tpu.pipeline_mode<synchronous>, transform_indices = @transform_1, window_bounds = array<i64: 32, 32>}, {pipeline_mode = #tpu.pipeline_mode<synchronous>, transform_indices = @transform_2, window_bounds = array<i64: 2, 32>}, {pipeline_mode = #tpu.pipeline_mode<synchronous>, transform_indices = @transform_3, window_bounds = array<i64: 32, 32>}, {transform_indices = @transform_4, window_bounds = array<i64: 16, 32>}]} {
    %c0 = arith.constant 0 : index
    %c0_0 = arith.constant 0 : index
    %0 = vector.load %arg1[%c0, %c0_0] : memref<16x32xf32, #tpu.memory_space<vmem>>, vector<16x32xf32>
    %cst = arith.constant dense<0.000000e+00> : vector<16xf32>
    %1 = vector.multi_reduction <add>, %0, %cst [1] : vector<16x32xf32> to vector<16xf32>
    %2 = vector.shape_cast %1 : vector<16xf32> to vector<16x1xf32>
    %cst_1 = arith.constant 3.200000e+01 : f32
    %3 = vector.broadcast %cst_1 : f32 to vector<16x1xf32>
    %4 = arith.divf %2, %3 : vector<16x1xf32>
    %5 = arith.mulf %0, %0 : vector<16x32xf32>
    %cst_2 = arith.constant dense<0.000000e+00> : vector<16xf32>
    %6 = vector.multi_reduction <add>, %5, %cst_2 [1] : vector<16x32xf32> to vector<16xf32>
    %7 = vector.shape_cast %6 : vector<16xf32> to vector<16x1xf32>
    %cst_3 = arith.constant 3.200000e+01 : f32
    %8 = vector.broadcast %cst_3 : f32 to vector<16x1xf32>
    %9 = arith.divf %7, %8 : vector<16x1xf32>
    %10 = arith.mulf %4, %4 : vector<16x1xf32>
    %11 = arith.subf %9, %10 : vector<16x1xf32>
    %cst_4 = arith.constant 0.000000e+00 : f32
    %12 = vector.broadcast %cst_4 : f32 to vector<16x1xf32>
    %13 = arith.maximumf %11, %12 : vector<16x1xf32>
    %14 = vector.broadcast %4 : vector<16x1xf32> to vector<16x32xf32>
    %15 = arith.subf %0, %14 : vector<16x32xf32>
    %cst_5 = arith.constant 9.99999974E-6 : f32
    %16 = vector.broadcast %cst_5 : f32 to vector<16x1xf32>
    %17 = arith.addf %13, %16 : vector<16x1xf32>
    %18 = math.rsqrt %17 : vector<16x1xf32>
    %19 = vector.broadcast %18 : vector<16x1xf32> to vector<16x32xf32>
    %20 = arith.mulf %15, %19 : vector<16x32xf32>
    %c0_6 = arith.constant 0 : index
    %c0_7 = arith.constant 0 : index
    %21 = vector.load %arg2[%c0_6, %c0_7] : memref<32x32xf32, #tpu.memory_space<vmem>>, vector<32x32xf32>
    %cst_8 = arith.constant dense<0.000000e+00> : vector<16x32xf32>
    %22 = tpu.matmul %20, %21, %cst_8 {dimension_numbers = #tpu.dot_dimension_numbers<[1], [0], [0], [1], [0, 0, 1, 1], [], []>} : vector<16x32xf32>, vector<32x32xf32>, vector<16x32xf32> -> vector<16x32xf32>
    %c0_9 = arith.constant 0 : index
    %c0_10 = arith.constant 0 : index
    %23 = vector.load %arg3[%c0_9, %c0_10] : memref<2x32xf32, #tpu.memory_space<vmem>>, vector<1x32xf32>
    %24 = vector.broadcast %23 : vector<1x32xf32> to vector<16x32xf32>
    %25 = arith.addf %22, %24 : vector<16x32xf32>
    %cst_11 = arith.constant 5.000000e-01 : f32
    %26 = vector.broadcast %cst_11 : f32 to vector<16x32xf32>
    %27 = arith.mulf %26, %25 : vector<16x32xf32>
    %cst_12 = arith.constant 0.707106769 : f32
    %28 = vector.broadcast %cst_12 : f32 to vector<16x32xf32>
    %29 = arith.mulf %25, %28 : vector<16x32xf32>
    %30 = math.absf %29 : vector<16x32xf32>
    %cst_13 = arith.constant 0.327591091 : f32
    %31 = vector.broadcast %cst_13 : f32 to vector<16x32xf32>
    %32 = arith.mulf %31, %30 : vector<16x32xf32>
    %cst_14 = arith.constant 1.000000e+00 : f32
    %33 = vector.broadcast %cst_14 : f32 to vector<16x32xf32>
    %34 = arith.addf %33, %32 : vector<16x32xf32>
    %cst_15 = arith.constant 1.000000e+00 : f32
    %35 = vector.broadcast %cst_15 : f32 to vector<16x32xf32>
    %36 = arith.divf %35, %34 : vector<16x32xf32>
    %cst_16 = arith.constant 1.06140542 : f32
    %37 = vector.broadcast %cst_16 : f32 to vector<16x32xf32>
    %38 = arith.mulf %36, %37 : vector<16x32xf32>
    %cst_17 = arith.constant -1.45315206 : f32
    %39 = vector.broadcast %cst_17 : f32 to vector<16x32xf32>
    %40 = arith.addf %39, %38 : vector<16x32xf32>
    %41 = arith.mulf %36, %40 : vector<16x32xf32>
    %cst_18 = arith.constant 1.42141378 : f32
    %42 = vector.broadcast %cst_18 : f32 to vector<16x32xf32>
    %43 = arith.addf %42, %41 : vector<16x32xf32>
    %44 = arith.mulf %36, %43 : vector<16x32xf32>
    %cst_19 = arith.constant -0.284496725 : f32
    %45 = vector.broadcast %cst_19 : f32 to vector<16x32xf32>
    %46 = arith.addf %45, %44 : vector<16x32xf32>
    %47 = arith.mulf %36, %46 : vector<16x32xf32>
    %cst_20 = arith.constant 0.254829586 : f32
    %48 = vector.broadcast %cst_20 : f32 to vector<16x32xf32>
    %49 = arith.addf %48, %47 : vector<16x32xf32>
    %50 = arith.mulf %36, %49 : vector<16x32xf32>
    %cst_21 = arith.constant 0.000000e+00 : f32
    %51 = vector.broadcast %cst_21 : f32 to vector<16x32xf32>
    %52 = arith.subf %51, %30 : vector<16x32xf32>
    %53 = arith.mulf %52, %30 : vector<16x32xf32>
    %54 = math.exp %53 : vector<16x32xf32>
    %55 = arith.mulf %50, %54 : vector<16x32xf32>
    %cst_22 = arith.constant 1.000000e+00 : f32
    %56 = vector.broadcast %cst_22 : f32 to vector<16x32xf32>
    %57 = arith.subf %56, %55 : vector<16x32xf32>
    %cst_23 = arith.constant 0.000000e+00 : f32
    %58 = vector.broadcast %cst_23 : f32 to vector<16x32xf32>
    %59 = arith.cmpf olt, %29, %58 : vector<16x32xf32>
    %cst_24 = arith.constant 0.000000e+00 : f32
    %60 = vector.broadcast %cst_24 : f32 to vector<16x32xf32>
    %61 = arith.subf %60, %57 : vector<16x32xf32>
    %62 = arith.select %59, %61, %57 : vector<16x32xi1>, vector<16x32xf32>
    %cst_25 = arith.constant 1.000000e+00 : f32
    %63 = vector.broadcast %cst_25 : f32 to vector<16x32xf32>
    %64 = arith.addf %63, %62 : vector<16x32xf32>
    %65 = arith.mulf %27, %64 : vector<16x32xf32>
    %c0_26 = arith.constant 0 : index
    %c0_27 = arith.constant 0 : index
    %66 = vector.load %arg4[%c0_26, %c0_27] : memref<32x32xf32, #tpu.memory_space<vmem>>, vector<32x32xf32>
    %cst_28 = arith.constant dense<0.000000e+00> : vector<16x32xf32>
    %67 = tpu.matmul %65, %66, %cst_28 {dimension_numbers = #tpu.dot_dimension_numbers<[1], [0], [0], [1], [0, 0, 1, 1], [], []>} : vector<16x32xf32>, vector<32x32xf32>, vector<16x32xf32> -> vector<16x32xf32>
    %c1 = arith.constant 1 : index
    %c0_29 = arith.constant 0 : index
    %68 = vector.load %arg3[%c1, %c0_29] : memref<2x32xf32, #tpu.memory_space<vmem>>, vector<1x32xf32>
    %69 = vector.broadcast %68 : vector<1x32xf32> to vector<16x32xf32>
    %70 = arith.addf %67, %69 : vector<16x32xf32>
    %c0_30 = arith.constant 0 : index
    %c0_31 = arith.constant 0 : index
    %71 = vector.load %arg1[%c0_30, %c0_31] : memref<16x32xf32, #tpu.memory_space<vmem>>, vector<16x32xf32>
    %72 = arith.addf %70, %71 : vector<16x32xf32>
    %c0_32 = arith.constant 0 : index
    %c0_33 = arith.constant 0 : index
    %73 = vector.load %arg5[%c0_32, %c0_33] : memref<16x32xf32, #tpu.memory_space<vmem>>, vector<16x32xf32>
    tpu.vector_store %arg5[%c0_32, %c0_33], %72 {strides = array<i32>} : memref<16x32xf32, #tpu.memory_space<vmem>>, vector<16x32xf32>,
    return
  }
  func.func @transform_0(%arg0: i32) -> (i32, i32) {
    %c0_i32 = arith.constant 0 : i32
    %c0_i32_0 = arith.constant 0 : i32
    return %arg0, %c0_i32 : i32, i32
  }
  func.func @transform_1(%arg0: i32) -> (i32, i32) {
    %c0_i32 = arith.constant 0 : i32
    %c0_i32_0 = arith.constant 0 : i32
    %c0_i32_1 = arith.constant 0 : i32
    return %c0_i32, %c0_i32_0 : i32, i32
  }
  func.func @transform_2(%arg0: i32) -> (i32, i32) {
    %c0_i32 = arith.constant 0 : i32
    %c0_i32_0 = arith.constant 0 : i32
    %c0_i32_1 = arith.constant 0 : i32
    return %c0_i32, %c0_i32_0 : i32, i32
  }
  func.func @transform_3(%arg0: i32) -> (i32, i32) {
    %c0_i32 = arith.constant 0 : i32
    %c0_i32_0 = arith.constant 0 : i32
    %c0_i32_1 = arith.constant 0 : i32
    return %c0_i32, %c0_i32_0 : i32, i32
  }
  func.func @transform_4(%arg0: i32) -> (i32, i32) {
    %c0_i32 = arith.constant 0 : i32
    %c0_i32_0 = arith.constant 0 : i32
    return %arg0, %c0_i32 : i32, i32
  }
}

module attributes {stable_mosaic.version = 11 : i64} {
  func.func @mlp1_kernel(%arg0: i32, %arg1: memref<16x32xf32, #tpu.memory_space<vmem>>, %arg2: memref<32x32xf32, #tpu.memory_space<vmem>>, %arg3: memref<2x32xf32, #tpu.memory_space<vmem>>, %arg4: memref<32x32xf32, #tpu.memory_space<vmem>>, %arg5: memref<16x32xf32, #tpu.memory_space<vmem>>) attributes {dimension_semantics = [#tpu.dimension_semantics<parallel>], iteration_bounds = array<i64: 1>, scalar_prefetch = 0 : i64, scratch_operands = 0 : i64, tpu.core_type = #tpu.core_type<tc>, window_params = [{transform_indices = @transform_0, window_bounds = array<i64: 16, 32>}, {pipeline_mode = #tpu.pipeline_mode<synchronous>, transform_indices = @transform_1, window_bounds = array<i64: 32, 32>}, {pipeline_mode = #tpu.pipeline_mode<synchronous>, transform_indices = @transform_2, window_bounds = array<i64: 2, 32>}, {pipeline_mode = #tpu.pipeline_mode<synchronous>, transform_indices = @transform_3, window_bounds = array<i64: 32, 32>}, {transform_indices = @transform_4, window_bounds = array<i64: 16, 32>}]} {
    %c0 = arith.constant 0 : index
    %c0_0 = arith.constant 0 : index
    %0 = vector.load %arg1[%c0, %c0_0] : memref<16x32xf32, #tpu.memory_space<vmem>>, vector<16x32xf32>
    %cst = arith.constant dense<0.000000e+00> : vector<16xf32>
    %1 = vector.multi_reduction <add>, %0, %cst [1] : vector<16x32xf32> to vector<16xf32>
    %2 = vector.shape_cast %1 : vector<16xf32> to vector<16x1xf32>
    %cst_1 = arith.constant 3.200000e+01 : f32
    %3 = vector.broadcast %cst_1 : f32 to vector<16x1xf32>
    %4 = arith.divf %2, %3 : vector<16x1xf32>
    %5 = arith.mulf %0, %0 : vector<16x32xf32>
    %cst_2 = arith.constant dense<0.000000e+00> : vector<16xf32>
    %6 = vector.multi_reduction <add>, %5, %cst_2 [1] : vector<16x32xf32> to vector<16xf32>
    %7 = vector.shape_cast %6 : vector<16xf32> to vector<16x1xf32>
    %cst_3 = arith.constant 3.200000e+01 : f32
    %8 = vector.broadcast %cst_3 : f32 to vector<16x1xf32>
    %9 = arith.divf %7, %8 : vector<16x1xf32>
    %10 = arith.mulf %4, %4 : vector<16x1xf32>
    %11 = arith.subf %9, %10 : vector<16x1xf32>
    %cst_4 = arith.constant 0.000000e+00 : f32
    %12 = vector.broadcast %cst_4 : f32 to vector<16x1xf32>
    %13 = arith.maximumf %11, %12 : vector<16x1xf32>
    %14 = vector.broadcast %4 : vector<16x1xf32> to vector<16x32xf32>
    %15 = arith.subf %0, %14 : vector<16x32xf32>
    %cst_5 = arith.constant 9.99999974E-6 : f32
    %16 = vector.broadcast %cst_5 : f32 to vector<16x1xf32>
    %17 = arith.addf %13, %16 : vector<16x1xf32>
    %18 = math.rsqrt %17 : vector<16x1xf32>
    %19 = vector.broadcast %18 : vector<16x1xf32> to vector<16x32xf32>
    %20 = arith.mulf %15, %19 : vector<16x32xf32>
    %c0_6 = arith.constant 0 : index
    %c0_7 = arith.constant 0 : index
    %21 = vector.load %arg2[%c0_6, %c0_7] : memref<32x32xf32, #tpu.memory_space<vmem>>, vector<32x32xf32>
    %cst_8 = arith.constant dense<0.000000e+00> : vector<16x32xf32>
    %22 = tpu.matmul %20, %21, %cst_8 {dimension_numbers = #tpu.dot_dimension_numbers<[1], [0], [0], [1], [0, 0, 1, 1], [], []>} : vector<16x32xf32>, vector<32x32xf32>, vector<16x32xf32> -> vector<16x32xf32>
    %c0_9 = arith.constant 0 : index
    %c0_10 = arith.constant 0 : index
    %23 = vector.load %arg3[%c0_9, %c0_10] : memref<2x32xf32, #tpu.memory_space<vmem>>, vector<1x32xf32>
    %24 = vector.broadcast %23 : vector<1x32xf32> to vector<16x32xf32>
    %25 = arith.addf %22, %24 : vector<16x32xf32>
    %cst_11 = arith.constant 5.000000e-01 : f32
    %26 = vector.broadcast %cst_11 : f32 to vector<16x32xf32>
    %27 = arith.mulf %26, %25 : vector<16x32xf32>
    %cst_12 = arith.constant 0.707106769 : f32
    %28 = vector.broadcast %cst_12 : f32 to vector<16x32xf32>
    %29 = arith.mulf %25, %28 : vector<16x32xf32>
    %30 = math.absf %29 : vector<16x32xf32>
    %cst_13 = arith.constant 0.327591091 : f32
    %31 = vector.broadcast %cst_13 : f32 to vector<16x32xf32>
    %32 = arith.mulf %31, %30 : vector<16x32xf32>
    %cst_14 = arith.constant 1.000000e+00 : f32
    %33 = vector.broadcast %cst_14 : f32 to vector<16x32xf32>
    %34 = arith.addf %33, %32 : vector<16x32xf32>
    %cst_15 = arith.constant 1.000000e+00 : f32
    %35 = vector.broadcast %cst_15 : f32 to vector<16x32xf32>
    %36 = arith.divf %35, %34 : vector<16x32xf32>
    %cst_16 = arith.constant 1.06140542 : f32
    %37 = vector.broadcast %cst_16 : f32 to vector<16x32xf32>
    %38 = arith.mulf %36, %37 : vector<16x32xf32>
    %cst_17 = arith.constant -1.45315206 : f32
    %39 = vector.broadcast %cst_17 : f32 to vector<16x32xf32>
    %40 = arith.addf %39, %38 : vector<16x32xf32>
    %41 = arith.mulf %36, %40 : vector<16x32xf32>
    %cst_18 = arith.constant 1.42141378 : f32
    %42 = vector.broadcast %cst_18 : f32 to vector<16x32xf32>
    %43 = arith.addf %42, %41 : vector<16x32xf32>
    %44 = arith.mulf %36, %43 : vector<16x32xf32>
    %cst_19 = arith.constant -0.284496725 : f32
    %45 = vector.broadcast %cst_19 : f32 to vector<16x32xf32>
    %46 = arith.addf %45, %44 : vector<16x32xf32>
    %47 = arith.mulf %36, %46 : vector<16x32xf32>
    %cst_20 = arith.constant 0.254829586 : f32
    %48 = vector.broadcast %cst_20 : f32 to vector<16x32xf32>
    %49 = arith.addf %48, %47 : vector<16x32xf32>
    %50 = arith.mulf %36, %49 : vector<16x32xf32>
    %cst_21 = arith.constant 0.000000e+00 : f32
    %51 = vector.broadcast %cst_21 : f32 to vector<16x32xf32>
    %52 = arith.subf %51, %30 : vector<16x32xf32>
    %53 = arith.mulf %52, %30 : vector<16x32xf32>
    %54 = math.exp %53 : vector<16x32xf32>
    %55 = arith.mulf %50, %54 : vector<16x32xf32>
    %cst_22 = arith.constant 1.000000e+00 : f32
    %56 = vector.broadcast %cst_22 : f32 to vector<16x32xf32>
    %57 = arith.subf %56, %55 : vector<16x32xf32>
    %cst_23 = arith.constant 0.000000e+00 : f32
    %58 = vector.broadcast %cst_23 : f32 to vector<16x32xf32>
    %59 = arith.cmpf olt, %29, %58 : vector<16x32xf32>
    %cst_24 = arith.constant 0.000000e+00 : f32
    %60 = vector.broadcast %cst_24 : f32 to vector<16x32xf32>
    %61 = arith.subf %60, %57 : vector<16x32xf32>
    %62 = arith.select %59, %61, %57 : vector<16x32xi1>, vector<16x32xf32>
    %cst_25 = arith.constant 1.000000e+00 : f32
    %63 = vector.broadcast %cst_25 : f32 to vector<16x32xf32>
    %64 = arith.addf %63, %62 : vector<16x32xf32>
    %65 = arith.mulf %27, %64 : vector<16x32xf32>
    %c0_26 = arith.constant 0 : index
    %c0_27 = arith.constant 0 : index
    %66 = vector.load %arg4[%c0_26, %c0_27] : memref<32x32xf32, #tpu.memory_space<vmem>>, vector<32x32xf32>
    %cst_28 = arith.constant dense<0.000000e+00> : vector<16x32xf32>
    %67 = tpu.matmul %65, %66, %cst_28 {dimension_numbers = #tpu.dot_dimension_numbers<[1], [0], [0], [1], [0, 0, 1, 1], [], []>} : vector<16x32xf32>, vector<32x32xf32>, vector<16x32xf32> -> vector<16x32xf32>
    %c1 = arith.constant 1 : index
    %c0_29 = arith.constant 0 : index
    %68 = vector.load %arg3[%c1, %c0_29] : memref<2x32xf32, #tpu.memory_space<vmem>>, vector<1x32xf32>
    %69 = vector.broadcast %68 : vector<1x32xf32> to vector<16x32xf32>
    %70 = arith.addf %67, %69 : vector<16x32xf32>
    %c0_30 = arith.constant 0 : index
    %c0_31 = arith.constant 0 : index
    %71 = vector.load %arg1[%c0_30, %c0_31] : memref<16x32xf32, #tpu.memory_space<vmem>>, vector<16x32xf32>
    %72 = arith.addf %70, %71 : vector<16x32xf32>
    %c0_32 = arith.constant 0 : index
    %c0_33 = arith.constant 0 : index
    %73 = vector.load %arg5[%c0_32, %c0_33] : memref<16x32xf32, #tpu.memory_space<vmem>>, vector<16x32xf32>
    tpu.vector_store %arg5[%c0_32, %c0_33], %72 {strides = array<i32>} : memref<16x32xf32, #tpu.memory_space<vmem>>, vector<16x32xf32>,
    return
  }
  func.func @transform_0(%arg0: i32) -> (i32, i32) {
    %c0_i32 = arith.constant 0 : i32
    %c0_i32_0 = arith.constant 0 : i32
    return %arg0, %c0_i32 : i32, i32
  }
  func.func @transform_1(%arg0: i32) -> (i32, i32) {
    %c0_i32 = arith.constant 0 : i32
    %c0_i32_0 = arith.constant 0 : i32
    %c0_i32_1 = arith.constant 0 : i32
    return %c0_i32, %c0_i32_0 : i32, i32
  }
  func.func @transform_2(%arg0: i32) -> (i32, i32) {
    %c0_i32 = arith.constant 0 : i32
    %c0_i32_0 = arith.constant 0 : i32
    %c0_i32_1 = arith.constant 0 : i32
    return %c0_i32, %c0_i32_0 : i32, i32
  }
  func.func @transform_3(%arg0: i32) -> (i32, i32) {
    %c0_i32 = arith.constant 0 : i32
    %c0_i32_0 = arith.constant 0 : i32
    %c0_i32_1 = arith.constant 0 : i32
    return %c0_i32, %c0_i32_0 : i32, i32
  }
  func.func @transform_4(%arg0: i32) -> (i32, i32) {
    %c0_i32 = arith.constant 0 : i32
    %c0_i32_0 = arith.constant 0 : i32
    return %arg0, %c0_i32 : i32, i32
  }
}

</mosaic_0001>

<bundles_post_ra>
// kernel: tpu_custom_call.1
= control target key start
LH: loop header
LB: loop body
LE: loop exit
PB: predicated region body
PF: predicated region fallthrough
CT: control target
= control target key end

     0   :  { %9 = vsyncpa [#allocation3], 0  ;;  %s578_s0 = inlined_call_operand.hbm [shape: f32[16,32], index: 0, kind: input, shape index: {}]   ;;  %s579_s1 = inlined_call_operand.hbm [shape: f32[32,32], index: 1, kind: input, shape index: {}]   ;;  %s580_s2 = inlined_call_operand.hbm [shape: f32[2,32], index: 2, kind: input, shape index: {}]   ;;  %s581_s3 = inlined_call_operand.hbm [shape: f32[32,32], index: 3, kind: input, shape index: {}]   ;;  %s582_s4 = inlined_call_operand.hbm [shape: f32[16,32], index: 4, kind: output, shape index: {}]  }
   0x1   :  { %10 = vsyncpa [#allocation6], 0 }
   0x2   :  { %11 = vsyncpa [#allocation9], 0 }
   0x3   :  { %12 = vsyncpa [#allocation4], 0  ;;  %s30_s17 = sshll.u32 %s579_s1, 4  ;;  %s478_s18 = smov [#allocation5]   ;;  %s31_s17 = int_to_ptr.hbm [resolvable:$true] %s30_s17 }
   0x4   :  { %s32_s19 = sshll.u32 %s478_s18, 4  ;;  %s17_s22 = sshll.u32 %s578_s0, 4  ;;  %s33_s19 = int_to_ptr.vmem [resolvable:$true] %s32_s19  ;;  %s18_s22 = int_to_ptr.hbm [resolvable:$true] %s17_s22 }
   0x5   :  { %s479_s23 = smov 128   ;;  %s480_s24 = smov 8  }
   0x6   :  { %38 = dma.hbm_to_vmem [thread:$0]  %s31_s17, 512, %s33_s19, [#allocation6], %s479_s23, %s479_s23, %s480_s24  }
   0x7   :  { %s481_s25 = smov [#allocation2]   ;;  %s44_s1 = sshll.u32 %s580_s2, 4  ;;  %s45_s1 = int_to_ptr.hbm [resolvable:$true] %s44_s1 }
   0x8   :  { %s19_s26 = sshll.u32 %s481_s25, 4  ;;  %s54_s30 = sshll.u32 %s581_s3, 4  ;;  %s20_s26 = int_to_ptr.vmem [resolvable:$true] %s19_s26  ;;  %s55_s30 = int_to_ptr.hbm [resolvable:$true] %s54_s30 }
   0x9   :  { %25 = dma.hbm_to_vmem [thread:$0]  %s18_s22, 256, %s20_s26, [#allocation3], %s479_s23, %s479_s23, %s480_s24  }
   0xa   :  { %s482_s5 = smov [#allocation7]   ;;  %s483_s7 = smov [#allocation8]  }
   0xb   :  { %s46_s6 = sshll.u32 %s482_s5, 4  ;;  %s56_s8 = sshll.u32 %s483_s7, 4  ;;  %s47_s6 = int_to_ptr.vmem [resolvable:$true] %s46_s6  ;;  %s57_s8 = int_to_ptr.vmem [resolvable:$true] %s56_s8 }
   0xc   :  { %49 = dma.hbm_to_vmem [thread:$0]  %s45_s1, 32, %s47_s6, [#allocation6]  }
   0xd   :  { %62 = dma.hbm_to_vmem [thread:$0]  %s55_s30, 512, %s57_s8, [#allocation9], %s479_s23, %s479_s23, %s480_s24  }
   0xe   :  { %470 = dma.done.wait [#allocation3], 256  }
   0xf   :  { %471 = vsyncadd [#allocation3], 4294967040 }
  0x10   :  { %472 = dma.done.wait [#allocation6], 544  }
  0x11   :  { %473 = vsyncadd [#allocation6], 4294966752 }
  0x12   :  { %474 = dma.done.wait [#allocation9], 512  }
  0x13   :  { %475 = vsyncadd [#allocation9], 4294966784  ;;  %vm81_vm0 = vcmask 261120   ;;  %v532_v0 = vld [vmem:[#allocation2 + $0x8] sm:$0xff]  ;;  %v534_v1 = vld [vmem:[#allocation2] sm:$0xff]  ;;  %v484_v8 = vmov 32.0  }
  0x14   :  { %v85_v2 = vsel %vm81_vm0, %v532_v0, 0.0  ;;  %v82_v3 = vsel %vm81_vm0, %v534_v1, 0.0  ;;  %v98_v4 = vmul.f32 %v532_v0, %v532_v0  ;;  %v97_v5 = vmul.f32 %v534_v1, %v534_v1  ;;  %v142_v14 = vld [vmem:[#allocation5 + $0x18] sm:$0xff]  ;;  %v141_v15 = vld [vmem:[#allocation5 + $0x10] sm:$0xff]  ;;  %v140_v18 = vld [vmem:[#allocation5 + $0x8] sm:$0xff]  ;;  %s485_s2 = smov [#allocation10]  }
  0x15   :  { %86 = vadd.xlane.f32.xlu0 %v85_v2  ;;  %83 = vadd.xlane.f32.xlu1 %v82_v3  ;;  %336 = vrcp.f32 %v484_v8  ;;  %v139_v20 = vld [vmem:[#allocation5] sm:$0xff]  ;;  %v256_v54 = vld [vmem:[#allocation8 + $0x10] sm:$0xff]  ;;  %v255_v56 = vld [vmem:[#allocation8 + $0x8] sm:$0xff]  ;;  %s297_s3 = sshll.u32 %s485_s2, 4  ;;  %s299_s11 = sshll.u32 %s582_s4, 4  ;;  %s298_s3 = int_to_ptr.vmem [resolvable:$true] %s297_s3  ;;  %s300_s11 = int_to_ptr.hbm [resolvable:$true] %s299_s11 }
  0x16   :  { %v102_v6 = vsel %vm81_vm0, %v98_v4, 0.0  ;;  %v99_v7 = vsel %vm81_vm0, %v97_v5, 0.0  ;;  %163 = vmatpush.msra.mxu0 %v142_v14  ;;  %318 = vmatpush.msra.mxu2 %v142_v14  ;;  %v257_v53 = vld [vmem:[#allocation8 + $0x18] sm:$0xff]  ;;  %v254_v57 = vld [vmem:[#allocation8] sm:$0xff] }
  0x17   :  { %278 = vmatpush.msra.mxu1 %v257_v53  ;;  %322 = vmatpush.msra.mxu3 %v257_v53  ;;  %v334_v55 = vld [vmem:[#allocation7] ss:$0 sm:$0xff] }
  0x18   :  { %164 = vmatpush.msra.mxu0 %v141_v15  ;;  %319 = vmatpush.msra.mxu2 %v141_v15 }
  0x19   :  { %279 = vmatpush.msra.mxu1 %v256_v54  ;;  %323 = vmatpush.msra.mxu3 %v256_v54 }
  0x1a   :  { %165 = vmatpush.msra.mxu0 %v140_v18  ;;  %320 = vmatpush.msra.mxu2 %v140_v18 }
  0x1b   :  { %v337_v9 = vpop.eup %336  ;;  %280 = vmatpush.msra.mxu1 %v255_v56  ;;  %324 = vmatpush.msra.mxu3 %v255_v56 }
  0x1c   :  { %v89_v10 = vmul.f32 32.0, %v337_v9  ;;  %vm93_vm1 = vweird.f32 %v337_v9  ;;  %166 = vmatpush.msra.mxu0 %v139_v20  ;;  %321 = vmatpush.msra.mxu2 %v139_v20 }
  0x1d   :  { %103 = vadd.xlane.f32.xlu0 %v102_v6  ;;  %100 = vadd.xlane.f32.xlu1 %v99_v7 }
  0x1e   :  { %v90_v11 = vsub.f32 1.0, %v89_v10  ;;  %281 = vmatpush.msra.mxu1 %v254_v57  ;;  %325 = vmatpush.msra.mxu3 %v254_v57 }
  0x20   :  { %v91_v12 = vmul.f32 %v337_v9, %v90_v11 }
  0x22   :  { %v92_v13 = vadd.f32 %v337_v9, %v91_v12 }
  0x24   :  { %v94_v19 = vsel %vm93_vm1, %v337_v9, %v92_v13 }
  0x88   :  { %v87_v16 = vpop.xlane.xlu0 %86  ;;  %v84_v17 = vpop.xlane.xlu1 %83 }
  0x89   :  { %v95_v21 = vmul.f32 %v94_v19, %v84_v17  ;;  %v96_v22 = vmul.f32 %v94_v19, %v87_v16 }
  0x8b   :  { %v107_v23 = vmul.f32 %v95_v21, %v95_v21  ;;  %v108_v26 = vmul.f32 %v96_v22, %v96_v22  ;;  %v114_v46 = vsub.f32 %v532_v0, %v96_v22  ;;  %v113_v48 = vsub.f32 %v534_v1, %v95_v21 }
  0x90   :  { %v104_v24 = vpop.xlane.xlu0 %103  ;;  %v101_v25 = vpop.xlane.xlu1 %100 }
  0x91   :  { %v106_v27 = vmul.f32 %v104_v24, %v94_v19  ;;  %v105_v28 = vmul.f32 %v101_v25, %v94_v19 }
  0x93   :  { %v110_v29 = vsub.f32 %v106_v27, %v108_v26  ;;  %v109_v30 = vsub.f32 %v105_v28, %v107_v23 }
  0x95   :  { %v112_v31 = vmax.f32 %v110_v29, 0.0  ;;  %v111_v32 = vmax.f32 %v109_v30, 0.0 }
  0x97   :  { %v116_v33 = vadd.f32 1e-05, %v112_v31  ;;  %v115_v34 = vadd.f32 1e-05, %v111_v32 }
  0x99   :  { %338 = vrsqrt.f32 %v116_v33  ;;  %vm123_vm3 = vweird.f32 %v115_v34  ;;  %vm133_vm5 = vweird.f32 %v116_v33 }
  0x9a   :  { %340 = vrsqrt.f32 %v115_v34 }
  0x9f   :  { %v339_v35 = vpop.eup %338 }
  0xa0   :  { %v341_v36 = vpop.eup %340  ;;  %v128_v37 = vmul.f32 %v339_v35, %v116_v33  ;;  %vm134_vm2 = vweird.f32 %v339_v35 }
  0xa1   :  { %v118_v38 = vmul.f32 %v341_v36, %v115_v34  ;;  %vm124_vm4 = vweird.f32 %v341_v36  ;;  %vm135_vm6 = vmor %vm133_vm5, %vm134_vm2 }
  0xa2   :  { %v129_v39 = vmul.f32 %v339_v35, %v128_v37  ;;  %vm125_vm7 = vmor %vm123_vm3, %vm124_vm4 }
  0xa3   :  { %v119_v40 = vmul.f32 %v341_v36, %v118_v38 }
  0xa4   :  { %v130_v41 = vmul.f32 0.5, %v129_v39 }
  0xa5   :  { %v120_v42 = vmul.f32 0.5, %v119_v40 }
  0xa6   :  { %v131_v43 = vsub.f32 1.5, %v130_v41 }
  0xa7   :  { %v121_v44 = vsub.f32 1.5, %v120_v42 }
  0xa8   :  { %v132_v45 = vmul.f32 %v339_v35, %v131_v43 }
  0xa9   :  { %v122_v47 = vmul.f32 %v341_v36, %v121_v44 }
  0xaa   :  { %v136_v49 = vsel %vm135_vm6, %v339_v35, %v132_v45 }
  0xab   :  { %v126_v50 = vsel %vm125_vm7, %v341_v36, %v122_v47  ;;  %v138_v51 = vmul.f32 %v136_v49, %v114_v46 }
  0xac   :  { %v137_v52 = vmul.f32 %v126_v50, %v113_v48 }
  0xad   :  { %315 = vmatmul.msk.f32.vlgmr.msra.gmra.mxu2 %vm81_vm0, %v138_v51 }
  0xae   :  { %314 = vmatmul.msk.f32.vlgmr.msra.gmra.mxu0 %vm81_vm0, %v137_v52 }
 0x12b   :  { %v168_v58 = vpop.f32.mrf.mxu0 }
 0x12c   :  { %v550_v59 = vadd.f32 %v334_v55, %v168_v58 }
 0x12e   :  { %v553_v60 = vmul.f32 0.70710677, %v550_v59 }
 0x130   :  { %v178_v61 = vand.u32 2147483647, %v553_v60  ;;  %v171_v62 = vpop.f32.mrf.mxu2  ;;  %vm244_vm1 = vcmp.lt.f32.partialorder %v553_v60, 0.0  ;;  %v335_v60 = vld [vmem:[#allocation7 + $0x1] ss:$0 sm:$0xff] }
 0x131   :  { %v556_v63 = vadd.f32 %v334_v55, %v171_v62 }
 0x132   :  { %v180_v2 = vmul.f32 0.3275911, %v178_v61  ;;  %v232_v19 = vsub.f32 0.0, %v178_v61 }
 0x133   :  { %v559_v3 = vmul.f32 0.70710677, %v556_v63 }
 0x134   :  { %v182_v4 = vadd.f32 1.0, %v180_v2  ;;  %v234_v29 = vmul.f32 %v232_v19, %v178_v61  ;;  %v174_v61 = vmul.f32 0.5, %v550_v59 }
 0x135   :  { %v179_v5 = vand.u32 2147483647, %v559_v3  ;;  %vm245_vm2 = vcmp.lt.f32.partialorder %v559_v3, 0.0 }
 0x136   :  { %342 = vrcp.f32 %v182_v4  ;;  %v195_v11 = vand.u32 2147483648, %v182_v4  ;;  %v193_v14 = vand.u32 2147483647, %v182_v4  ;;  %vm189_vm9 = vweird.f32 %v182_v4 }
 0x137   :  { %v181_v6 = vmul.f32 0.3275911, %v179_v5  ;;  %v233_v31 = vsub.f32 0.0, %v179_v5  ;;  %v236_v36 = vmul.f32 1.442695, %v234_v29 }
 0x138   :  { %v196_v17 = vor.u32 1.1754944e-38, %v195_v11  ;;  %vm194_vm11 = vcmp.eq.f32.partialorder %v193_v14, 8.507059e+37 }
 0x139   :  { %v183_v7 = vadd.f32 1.0, %v181_v6  ;;  %v235_v38 = vmul.f32 %v233_v31, %v179_v5 }
 0x13b   :  { %344 = vrcp.f32 %v183_v7  ;;  %v210_v20 = vand.u32 2147483648, %v183_v7  ;;  %v208_v23 = vand.u32 2147483647, %v183_v7  ;;  %vm204_vm13 = vweird.f32 %v183_v7 }
 0x13c   :  { %v343_v8 = vpop.eup %342  ;;  %346 = vpow2.f32 %v236_v36  ;;  %v238_v43 = vmul.f32 1.442695, %v235_v38 }
 0x13d   :  { %v185_v9 = vmul.f32 %v343_v8, %v182_v4  ;;  %vm190_vm8 = vweird.f32 %v343_v8  ;;  %v211_v27 = vor.u32 1.1754944e-38, %v210_v20  ;;  %vm209_vm15 = vcmp.eq.f32.partialorder %v208_v23, 8.507059e+37 }
 0x13e   :  { %vm191_vm10 = vmor %vm189_vm9, %vm190_vm8  ;;  %348 = vpow2.f32 %v238_v43 }
 0x13f   :  { %v186_v10 = vsub.f32 1.0, %v185_v9 }
 0x141   :  { %v345_v12 = vpop.eup %344  ;;  %v187_v13 = vmul.f32 %v343_v8, %v186_v10 }
 0x142   :  { %v200_v15 = vmul.f32 %v345_v12, %v183_v7  ;;  %vm205_vm12 = vweird.f32 %v345_v12  ;;  %v347_v49 = vpop.eup %346  ;;  %v175_v7 = vmul.f32 0.5, %v556_v63 }
 0x143   :  { %v188_v16 = vadd.f32 %v343_v8, %v187_v13  ;;  %vm206_vm14 = vmor %vm204_vm13, %vm205_vm12 }
 0x144   :  { %v201_v18 = vsub.f32 1.0, %v200_v15  ;;  %v349_v55 = vpop.eup %348 }
 0x145   :  { %v192_v21 = vsel %vm191_vm10, %v343_v8, %v188_v16 }
 0x146   :  { %v202_v22 = vmul.f32 %v345_v12, %v201_v18  ;;  %v197_v24 = vsel %vm194_vm11, %v196_v17, %v192_v21 }
 0x147   :  { %v214_v25 = vmul.f32 1.0614054, %v197_v24 }
 0x148   :  { %v203_v26 = vadd.f32 %v345_v12, %v202_v22 }
 0x149   :  { %v216_v28 = vadd.f32 -1.4531521, %v214_v25 }
 0x14a   :  { %v207_v30 = vsel %vm206_vm14, %v345_v12, %v203_v26 }
 0x14b   :  { %v218_v32 = vmul.f32 %v216_v28, %v197_v24  ;;  %v212_v33 = vsel %vm209_vm15, %v211_v27, %v207_v30 }
 0x14c   :  { %v215_v34 = vmul.f32 1.0614054, %v212_v33 }
 0x14d   :  { %v220_v35 = vadd.f32 1.4214138, %v218_v32 }
 0x14e   :  { %v217_v37 = vadd.f32 -1.4531521, %v215_v34 }
 0x14f   :  { %v222_v39 = vmul.f32 %v220_v35, %v197_v24 }
 0x150   :  { %v219_v40 = vmul.f32 %v217_v37, %v212_v33 }
 0x151   :  { %v224_v41 = vadd.f32 -0.28449672, %v222_v39 }
 0x152   :  { %v221_v42 = vadd.f32 1.4214138, %v219_v40 }
 0x153   :  { %v226_v44 = vmul.f32 %v224_v41, %v197_v24 }
 0x154   :  { %v223_v45 = vmul.f32 %v221_v42, %v212_v33 }
 0x155   :  { %v228_v46 = vadd.f32 0.2548296, %v226_v44 }
 0x156   :  { %v225_v47 = vadd.f32 -0.28449672, %v223_v45 }
 0x157   :  { %v230_v48 = vmul.f32 %v228_v46, %v197_v24 }
 0x158   :  { %v227_v50 = vmul.f32 %v225_v47, %v212_v33 }
 0x159   :  { %v240_v51 = vmul.f32 %v347_v49, %v230_v48 }
 0x15a   :  { %v229_v52 = vadd.f32 0.2548296, %v227_v50 }
 0x15b   :  { %v242_v53 = vsub.f32 1.0, %v240_v51 }
 0x15c   :  { %v231_v54 = vmul.f32 %v229_v52, %v212_v33 }
 0x15d   :  { %v246_v56 = vsub.f32 0.0, %v242_v53 }
 0x15e   :  { %v241_v57 = vmul.f32 %v349_v55, %v231_v54 }
 0x15f   :  { %v248_v58 = vsel %vm244_vm1, %v246_v56, %v242_v53 }
 0x160   :  { %v250_v62 = vadd.f32 1.0, %v248_v58  ;;  %v243_v2 = vsub.f32 1.0, %v241_v57 }
 0x162   :  { %v252_v4 = vmul.f32 %v250_v62, %v174_v61  ;;  %v247_v5 = vsub.f32 0.0, %v243_v2 }
 0x164   :  { %316 = vmatmul.msk.f32.vlgmr.msra.gmra.mxu1 %vm81_vm0, %v252_v4  ;;  %v249_v6 = vsel %vm245_vm2, %v247_v5, %v243_v2 }
 0x165   :  { %v251_v8 = vadd.f32 1.0, %v249_v6 }
 0x167   :  { %v253_v9 = vmul.f32 %v251_v8, %v175_v7 }
 0x169   :  { %317 = vmatmul.msk.f32.vlgmr.msra.gmra.mxu3 %vm81_vm0, %v253_v9 }
 0x1e1   :  { %v283_v10 = vpop.f32.mrf.mxu1 }
 0x1e2   :  { %v284_v11 = vadd.f32 %v335_v60, %v283_v10 }
 0x1e4   :  { %v289_v59 = vadd.f32 %v284_v11, %v534_v1 }
 0x1e6   :  { %291 = vst.msk [vmem:[#allocation10] sm:$0xff] %vm81_vm0, %v289_v59 }
 0x1ec   :  { %v286_v12 = vpop.f32.mrf.mxu3 }
 0x1ed   :  { %v287_v3 = vadd.f32 %v335_v60, %v286_v12 }
 0x1ef   :  { %v290_v63 = vadd.f32 %v287_v3, %v532_v0 }
 0x1f1   :  { %292 = vst.msk [vmem:[#allocation10 + $0x8] sm:$0xff] %vm81_vm0, %v290_v63 }
 0x1f2   :  { %305 = dma.vmem_to_hbm [thread:$0]  %s298_s3, 256, %s300_s11, [#allocation4], %s479_s23, %s479_s23, %s480_s24  }
 0x1f3   :  { %476 = dma.done.wait [#allocation4], 256  }
 0x1f4   :  { %477 = vsyncadd [#allocation4], 4294967040 }
 0x1f5   :  { %310 = vsyncpa [#allocation3], 1 }
 0x1f6   :  { %311 = vsyncpa [#allocation6], 1 }
 0x1f7   :  { %312 = vsyncpa [#allocation9], 1 }
 0x1f8   :  { %313 = vsyncpa [#allocation4], 1 }

// kernel: tpu_custom_call.1
= control target key start
LH: loop header
LB: loop body
LE: loop exit
PB: predicated region body
PF: predicated region fallthrough
CT: control target
= control target key end

     0   :  { %9 = vsyncpa [#allocation3], 0  ;;  %s578_s0 = inlined_call_operand.hbm [shape: f32[16,32], index: 0, kind: input, shape index: {}]   ;;  %s579_s1 = inlined_call_operand.hbm [shape: f32[32,32], index: 1, kind: input, shape index: {}]   ;;  %s580_s2 = inlined_call_operand.hbm [shape: f32[2,32], index: 2, kind: input, shape index: {}]   ;;  %s581_s3 = inlined_call_operand.hbm [shape: f32[32,32], index: 3, kind: input, shape index: {}]   ;;  %s582_s4 = inlined_call_operand.hbm [shape: f32[16,32], index: 4, kind: output, shape index: {}]  }
   0x1   :  { %10 = vsyncpa [#allocation6], 0 }
   0x2   :  { %11 = vsyncpa [#allocation9], 0 }
   0x3   :  { %12 = vsyncpa [#allocation4], 0  ;;  %s30_s17 = sshll.u32 %s579_s1, 4  ;;  %s478_s18 = smov [#allocation5]   ;;  %s31_s17 = int_to_ptr.hbm [resolvable:$true] %s30_s17 }
   0x4   :  { %s32_s19 = sshll.u32 %s478_s18, 4  ;;  %s17_s22 = sshll.u32 %s578_s0, 4  ;;  %s33_s19 = int_to_ptr.vmem [resolvable:$true] %s32_s19  ;;  %s18_s22 = int_to_ptr.hbm [resolvable:$true] %s17_s22 }
   0x5   :  { %s479_s23 = smov 128   ;;  %s480_s24 = smov 8  }
   0x6   :  { %38 = dma.hbm_to_vmem [thread:$0]  %s31_s17, 512, %s33_s19, [#allocation6], %s479_s23, %s479_s23, %s480_s24  }
   0x7   :  { %s481_s25 = smov [#allocation2]   ;;  %s44_s1 = sshll.u32 %s580_s2, 4  ;;  %s45_s1 = int_to_ptr.hbm [resolvable:$true] %s44_s1 }
   0x8   :  { %s19_s26 = sshll.u32 %s481_s25, 4  ;;  %s54_s30 = sshll.u32 %s581_s3, 4  ;;  %s20_s26 = int_to_ptr.vmem [resolvable:$true] %s19_s26  ;;  %s55_s30 = int_to_ptr.hbm [resolvable:$true] %s54_s30 }
   0x9   :  { %25 = dma.hbm_to_vmem [thread:$0]  %s18_s22, 256, %s20_s26, [#allocation3], %s479_s23, %s479_s23, %s480_s24  }
   0xa   :  { %s482_s5 = smov [#allocation7]   ;;  %s483_s7 = smov [#allocation8]  }
   0xb   :  { %s46_s6 = sshll.u32 %s482_s5, 4  ;;  %s56_s8 = sshll.u32 %s483_s7, 4  ;;  %s47_s6 = int_to_ptr.vmem [resolvable:$true] %s46_s6  ;;  %s57_s8 = int_to_ptr.vmem [resolvable:$true] %s56_s8 }
   0xc   :  { %49 = dma.hbm_to_vmem [thread:$0]  %s45_s1, 32, %s47_s6, [#allocation6]  }
   0xd   :  { %62 = dma.hbm_to_vmem [thread:$0]  %s55_s30, 512, %s57_s8, [#allocation9], %s479_s23, %s479_s23, %s480_s24  }
   0xe   :  { %470 = dma.done.wait [#allocation3], 256  }
   0xf   :  { %471 = vsyncadd [#allocation3], 4294967040 }
  0x10   :  { %472 = dma.done.wait [#allocation6], 544  }
  0x11   :  { %473 = vsyncadd [#allocation6], 4294966752 }
  0x12   :  { %474 = dma.done.wait [#allocation9], 512  }
  0x13   :  { %475 = vsyncadd [#allocation9], 4294966784  ;;  %vm81_vm0 = vcmask 261120   ;;  %v532_v0 = vld [vmem:[#allocation2 + $0x8] sm:$0xff]  ;;  %v534_v1 = vld [vmem:[#allocation2] sm:$0xff]  ;;  %v484_v8 = vmov 32.0  }
  0x14   :  { %v85_v2 = vsel %vm81_vm0, %v532_v0, 0.0  ;;  %v82_v3 = vsel %vm81_vm0, %v534_v1, 0.0  ;;  %v98_v4 = vmul.f32 %v532_v0, %v532_v0  ;;  %v97_v5 = vmul.f32 %v534_v1, %v534_v1  ;;  %v142_v14 = vld [vmem:[#allocation5 + $0x18] sm:$0xff]  ;;  %v141_v15 = vld [vmem:[#allocation5 + $0x10] sm:$0xff]  ;;  %v140_v18 = vld [vmem:[#allocation5 + $0x8] sm:$0xff]  ;;  %s485_s2 = smov [#allocation10]  }
  0x15   :  { %86 = vadd.xlane.f32.xlu0 %v85_v2  ;;  %83 = vadd.xlane.f32.xlu1 %v82_v3  ;;  %336 = vrcp.f32 %v484_v8  ;;  %v139_v20 = vld [vmem:[#allocation5] sm:$0xff]  ;;  %v256_v54 = vld [vmem:[#allocation8 + $0x10] sm:$0xff]  ;;  %v255_v56 = vld [vmem:[#allocation8 + $0x8] sm:$0xff]  ;;  %s297_s3 = sshll.u32 %s485_s2, 4  ;;  %s299_s11 = sshll.u32 %s582_s4, 4  ;;  %s298_s3 = int_to_ptr.vmem [resolvable:$true] %s297_s3  ;;  %s300_s11 = int_to_ptr.hbm [resolvable:$true] %s299_s11 }
  0x16   :  { %v102_v6 = vsel %vm81_vm0, %v98_v4, 0.0  ;;  %v99_v7 = vsel %vm81_vm0, %v97_v5, 0.0  ;;  %163 = vmatpush.msra.mxu0 %v142_v14  ;;  %318 = vmatpush.msra.mxu2 %v142_v14  ;;  %v257_v53 = vld [vmem:[#allocation8 + $0x18] sm:$0xff]  ;;  %v254_v57 = vld [vmem:[#allocation8] sm:$0xff] }
  0x17   :  { %278 = vmatpush.msra.mxu1 %v257_v53  ;;  %322 = vmatpush.msra.mxu3 %v257_v53  ;;  %v334_v55 = vld [vmem:[#allocation7] ss:$0 sm:$0xff] }
  0x18   :  { %164 = vmatpush.msra.mxu0 %v141_v15  ;;  %319 = vmatpush.msra.mxu2 %v141_v15 }
  0x19   :  { %279 = vmatpush.msra.mxu1 %v256_v54  ;;  %323 = vmatpush.msra.mxu3 %v256_v54 }
  0x1a   :  { %165 = vmatpush.msra.mxu0 %v140_v18  ;;  %320 = vmatpush.msra.mxu2 %v140_v18 }
  0x1b   :  { %v337_v9 = vpop.eup %336  ;;  %280 = vmatpush.msra.mxu1 %v255_v56  ;;  %324 = vmatpush.msra.mxu3 %v255_v56 }
  0x1c   :  { %v89_v10 = vmul.f32 32.0, %v337_v9  ;;  %vm93_vm1 = vweird.f32 %v337_v9  ;;  %166 = vmatpush.msra.mxu0 %v139_v20  ;;  %321 = vmatpush.msra.mxu2 %v139_v20 }
  0x1d   :  { %103 = vadd.xlane.f32.xlu0 %v102_v6  ;;  %100 = vadd.xlane.f32.xlu1 %v99_v7 }
  0x1e   :  { %v90_v11 = vsub.f32 1.0, %v89_v10  ;;  %281 = vmatpush.msra.mxu1 %v254_v57  ;;  %325 = vmatpush.msra.mxu3 %v254_v57 }
  0x20   :  { %v91_v12 = vmul.f32 %v337_v9, %v90_v11 }
  0x22   :  { %v92_v13 = vadd.f32 %v337_v9, %v91_v12 }
  0x24   :  { %v94_v19 = vsel %vm93_vm1, %v337_v9, %v92_v13 }
  0x88   :  { %v87_v16 = vpop.xlane.xlu0 %86  ;;  %v84_v17 = vpop.xlane.xlu1 %83 }
  0x89   :  { %v95_v21 = vmul.f32 %v94_v19, %v84_v17  ;;  %v96_v22 = vmul.f32 %v94_v19, %v87_v16 }
  0x8b   :  { %v107_v23 = vmul.f32 %v95_v21, %v95_v21  ;;  %v108_v26 = vmul.f32 %v96_v22, %v96_v22  ;;  %v114_v46 = vsub.f32 %v532_v0, %v96_v22  ;;  %v113_v48 = vsub.f32 %v534_v1, %v95_v21 }
  0x90   :  { %v104_v24 = vpop.xlane.xlu0 %103  ;;  %v101_v25 = vpop.xlane.xlu1 %100 }
  0x91   :  { %v106_v27 = vmul.f32 %v104_v24, %v94_v19  ;;  %v105_v28 = vmul.f32 %v101_v25, %v94_v19 }
  0x93   :  { %v110_v29 = vsub.f32 %v106_v27, %v108_v26  ;;  %v109_v30 = vsub.f32 %v105_v28, %v107_v23 }
  0x95   :  { %v112_v31 = vmax.f32 %v110_v29, 0.0  ;;  %v111_v32 = vmax.f32 %v109_v30, 0.0 }
  0x97   :  { %v116_v33 = vadd.f32 1e-05, %v112_v31  ;;  %v115_v34 = vadd.f32 1e-05, %v111_v32 }
  0x99   :  { %338 = vrsqrt.f32 %v116_v33  ;;  %vm123_vm3 = vweird.f32 %v115_v34  ;;  %vm133_vm5 = vweird.f32 %v116_v33 }
  0x9a   :  { %340 = vrsqrt.f32 %v115_v34 }
  0x9f   :  { %v339_v35 = vpop.eup %338 }
  0xa0   :  { %v341_v36 = vpop.eup %340  ;;  %v128_v37 = vmul.f32 %v339_v35, %v116_v33  ;;  %vm134_vm2 = vweird.f32 %v339_v35 }
  0xa1   :  { %v118_v38 = vmul.f32 %v341_v36, %v115_v34  ;;  %vm124_vm4 = vweird.f32 %v341_v36  ;;  %vm135_vm6 = vmor %vm133_vm5, %vm134_vm2 }
  0xa2   :  { %v129_v39 = vmul.f32 %v339_v35, %v128_v37  ;;  %vm125_vm7 = vmor %vm123_vm3, %vm124_vm4 }
  0xa3   :  { %v119_v40 = vmul.f32 %v341_v36, %v118_v38 }
  0xa4   :  { %v130_v41 = vmul.f32 0.5, %v129_v39 }
  0xa5   :  { %v120_v42 = vmul.f32 0.5, %v119_v40 }
  0xa6   :  { %v131_v43 = vsub.f32 1.5, %v130_v41 }
  0xa7   :  { %v121_v44 = vsub.f32 1.5, %v120_v42 }
  0xa8   :  { %v132_v45 = vmul.f32 %v339_v35, %v131_v43 }
  0xa9   :  { %v122_v47 = vmul.f32 %v341_v36, %v121_v44 }
  0xaa   :  { %v136_v49 = vsel %vm135_vm6, %v339_v35, %v132_v45 }
  0xab   :  { %v126_v50 = vsel %vm125_vm7, %v341_v36, %v122_v47  ;;  %v138_v51 = vmul.f32 %v136_v49, %v114_v46 }
  0xac   :  { %v137_v52 = vmul.f32 %v126_v50, %v113_v48 }
  0xad   :  { %315 = vmatmul.msk.f32.vlgmr.msra.gmra.mxu2 %vm81_vm0, %v138_v51 }
  0xae   :  { %314 = vmatmul.msk.f32.vlgmr.msra.gmra.mxu0 %vm81_vm0, %v137_v52 }
 0x12b   :  { %v168_v58 = vpop.f32.mrf.mxu0 }
 0x12c   :  { %v550_v59 = vadd.f32 %v334_v55, %v168_v58 }
 0x12e   :  { %v553_v60 = vmul.f32 0.70710677, %v550_v59 }
 0x130   :  { %v178_v61 = vand.u32 2147483647, %v553_v60  ;;  %v171_v62 = vpop.f32.mrf.mxu2  ;;  %vm244_vm1 = vcmp.lt.f32.partialorder %v553_v60, 0.0  ;;  %v335_v60 = vld [vmem:[#allocation7 + $0x1] ss:$0 sm:$0xff] }
 0x131   :  { %v556_v63 = vadd.f32 %v334_v55, %v171_v62 }
 0x132   :  { %v180_v2 = vmul.f32 0.3275911, %v178_v61  ;;  %v232_v19 = vsub.f32 0.0, %v178_v61 }
 0x133   :  { %v559_v3 = vmul.f32 0.70710677, %v556_v63 }
 0x134   :  { %v182_v4 = vadd.f32 1.0, %v180_v2  ;;  %v234_v29 = vmul.f32 %v232_v19, %v178_v61  ;;  %v174_v61 = vmul.f32 0.5, %v550_v59 }
 0x135   :  { %v179_v5 = vand.u32 2147483647, %v559_v3  ;;  %vm245_vm2 = vcmp.lt.f32.partialorder %v559_v3, 0.0 }
 0x136   :  { %342 = vrcp.f32 %v182_v4  ;;  %v195_v11 = vand.u32 2147483648, %v182_v4  ;;  %v193_v14 = vand.u32 2147483647, %v182_v4  ;;  %vm189_vm9 = vweird.f32 %v182_v4 }
 0x137   :  { %v181_v6 = vmul.f32 0.3275911, %v179_v5  ;;  %v233_v31 = vsub.f32 0.0, %v179_v5  ;;  %v236_v36 = vmul.f32 1.442695, %v234_v29 }
 0x138   :  { %v196_v17 = vor.u32 1.1754944e-38, %v195_v11  ;;  %vm194_vm11 = vcmp.eq.f32.partialorder %v193_v14, 8.507059e+37 }
 0x139   :  { %v183_v7 = vadd.f32 1.0, %v181_v6  ;;  %v235_v38 = vmul.f32 %v233_v31, %v179_v5 }
 0x13b   :  { %344 = vrcp.f32 %v183_v7  ;;  %v210_v20 = vand.u32 2147483648, %v183_v7  ;;  %v208_v23 = vand.u32 2147483647, %v183_v7  ;;  %vm204_vm13 = vweird.f32 %v183_v7 }
 0x13c   :  { %v343_v8 = vpop.eup %342  ;;  %346 = vpow2.f32 %v236_v36  ;;  %v238_v43 = vmul.f32 1.442695, %v235_v38 }
 0x13d   :  { %v185_v9 = vmul.f32 %v343_v8, %v182_v4  ;;  %vm190_vm8 = vweird.f32 %v343_v8  ;;  %v211_v27 = vor.u32 1.1754944e-38, %v210_v20  ;;  %vm209_vm15 = vcmp.eq.f32.partialorder %v208_v23, 8.507059e+37 }
 0x13e   :  { %vm191_vm10 = vmor %vm189_vm9, %vm190_vm8  ;;  %348 = vpow2.f32 %v238_v43 }
 0x13f   :  { %v186_v10 = vsub.f32 1.0, %v185_v9 }
 0x141   :  { %v345_v12 = vpop.eup %344  ;;  %v187_v13 = vmul.f32 %v343_v8, %v186_v10 }
 0x142   :  { %v200_v15 = vmul.f32 %v345_v12, %v183_v7  ;;  %vm205_vm12 = vweird.f32 %v345_v12  ;;  %v347_v49 = vpop.eup %346  ;;  %v175_v7 = vmul.f32 0.5, %v556_v63 }
 0x143   :  { %v188_v16 = vadd.f32 %v343_v8, %v187_v13  ;;  %vm206_vm14 = vmor %vm204_vm13, %vm205_vm12 }
 0x144   :  { %v201_v18 = vsub.f32 1.0, %v200_v15  ;;  %v349_v55 = vpop.eup %348 }
 0x145   :  { %v192_v21 = vsel %vm191_vm10, %v343_v8, %v188_v16 }
 0x146   :  { %v202_v22 = vmul.f32 %v345_v12, %v201_v18  ;;  %v197_v24 = vsel %vm194_vm11, %v196_v17, %v192_v21 }
 0x147   :  { %v214_v25 = vmul.f32 1.0614054, %v197_v24 }
 0x148   :  { %v203_v26 = vadd.f32 %v345_v12, %v202_v22 }
 0x149   :  { %v216_v28 = vadd.f32 -1.4531521, %v214_v25 }
 0x14a   :  { %v207_v30 = vsel %vm206_vm14, %v345_v12, %v203_v26 }
 0x14b   :  { %v218_v32 = vmul.f32 %v216_v28, %v197_v24  ;;  %v212_v33 = vsel %vm209_vm15, %v211_v27, %v207_v30 }
 0x14c   :  { %v215_v34 = vmul.f32 1.0614054, %v212_v33 }
 0x14d   :  { %v220_v35 = vadd.f32 1.4214138, %v218_v32 }
 0x14e   :  { %v217_v37 = vadd.f32 -1.4531521, %v215_v34 }
 0x14f   :  { %v222_v39 = vmul.f32 %v220_v35, %v197_v24 }
 0x150   :  { %v219_v40 = vmul.f32 %v217_v37, %v212_v33 }
 0x151   :  { %v224_v41 = vadd.f32 -0.28449672, %v222_v39 }
 0x152   :  { %v221_v42 = vadd.f32 1.4214138, %v219_v40 }
 0x153   :  { %v226_v44 = vmul.f32 %v224_v41, %v197_v24 }
 0x154   :  { %v223_v45 = vmul.f32 %v221_v42, %v212_v33 }
 0x155   :  { %v228_v46 = vadd.f32 0.2548296, %v226_v44 }
 0x156   :  { %v225_v47 = vadd.f32 -0.28449672, %v223_v45 }
 0x157   :  { %v230_v48 = vmul.f32 %v228_v46, %v197_v24 }
 0x158   :  { %v227_v50 = vmul.f32 %v225_v47, %v212_v33 }
 0x159   :  { %v240_v51 = vmul.f32 %v347_v49, %v230_v48 }
 0x15a   :  { %v229_v52 = vadd.f32 0.2548296, %v227_v50 }
 0x15b   :  { %v242_v53 = vsub.f32 1.0, %v240_v51 }
 0x15c   :  { %v231_v54 = vmul.f32 %v229_v52, %v212_v33 }
 0x15d   :  { %v246_v56 = vsub.f32 0.0, %v242_v53 }
 0x15e   :  { %v241_v57 = vmul.f32 %v349_v55, %v231_v54 }
 0x15f   :  { %v248_v58 = vsel %vm244_vm1, %v246_v56, %v242_v53 }
 0x160   :  { %v250_v62 = vadd.f32 1.0, %v248_v58  ;;  %v243_v2 = vsub.f32 1.0, %v241_v57 }
 0x162   :  { %v252_v4 = vmul.f32 %v250_v62, %v174_v61  ;;  %v247_v5 = vsub.f32 0.0, %v243_v2 }
 0x164   :  { %316 = vmatmul.msk.f32.vlgmr.msra.gmra.mxu1 %vm81_vm0, %v252_v4  ;;  %v249_v6 = vsel %vm245_vm2, %v247_v5, %v243_v2 }
 0x165   :  { %v251_v8 = vadd.f32 1.0, %v249_v6 }
 0x167   :  { %v253_v9 = vmul.f32 %v251_v8, %v175_v7 }
 0x169   :  { %317 = vmatmul.msk.f32.vlgmr.msra.gmra.mxu3 %vm81_vm0, %v253_v9 }
 0x1e1   :  { %v283_v10 = vpop.f32.mrf.mxu1 }
 0x1e2   :  { %v284_v11 = vadd.f32 %v335_v60, %v283_v10 }
 0x1e4   :  { %v289_v59 = vadd.f32 %v284_v11, %v534_v1 }
 0x1e6   :  { %291 = vst.msk [vmem:[#allocation10] sm:$0xff] %vm81_vm0, %v289_v59 }
 0x1ec   :  { %v286_v12 = vpop.f32.mrf.mxu3 }
 0x1ed   :  { %v287_v3 = vadd.f32 %v335_v60, %v286_v12 }
 0x1ef   :  { %v290_v63 = vadd.f32 %v287_v3, %v532_v0 }
 0x1f1   :  { %292 = vst.msk [vmem:[#allocation10 + $0x8] sm:$0xff] %vm81_vm0, %v290_v63 }
 0x1f2   :  { %305 = dma.vmem_to_hbm [thread:$0]  %s298_s3, 256, %s300_s11, [#allocation4], %s479_s23, %s479_s23, %s480_s24  }
 0x1f3   :  { %476 = dma.done.wait [#allocation4], 256  }
 0x1f4   :  { %477 = vsyncadd [#allocation4], 4294967040 }
 0x1f5   :  { %310 = vsyncpa [#allocation3], 1 }
 0x1f6   :  { %311 = vsyncpa [#allocation6], 1 }
 0x1f7   :  { %312 = vsyncpa [#allocation9], 1 }
 0x1f8   :  { %313 = vsyncpa [#allocation4], 1 }

</bundles_post_ra>
